<compile_context>
chip_gen: v7x
topology: tpu7x:2x2x1
jax: 0.10.0
libtpu: 0.0.40
codegen_flags: <defaults>
</compile_context>

<pallas_src>
import functools

import jax
import jax.numpy as jnp
from jax import lax
from jax.experimental import pallas as pl
from jax.experimental.pallas import tpu as pltpu

LANE = 128          # f32 lane width
SUBLANE = 8         # f32 sublane width
TILE_QUANTUM = 256  # batch-tile granularity (keeps the transposed output lane-dense)
DEFAULT_TILE_B = 2048


def _round_up(x, m):
    return ((x + m - 1) // m) * m


def _pad2d(x, rows, cols):
    r, c = x.shape
    if r == rows and c == cols:
        return x
    return jnp.pad(x, ((0, rows - r), (0, cols - c)))


def _actor_kernel(obs_ref, w1_ref, b1_ref, w2_ref, b2_ref, w3t_ref, b3t_ref,
                  out_ref, *, act_limit):
    # Layer 1: Linear + ReLU.  K = true obs_dim (<128 is fine; Mosaic pads the
    # contraction dim in-register at no HBM cost).
    h = jnp.dot(obs_ref[...], w1_ref[...],
                preferred_element_type=jnp.float32) + b1_ref[...]
    h = jnp.maximum(h, 0.0)
    # Layer 2: Linear + ReLU.
    h = jnp.dot(h, w2_ref[...],
                preferred_element_type=jnp.float32) + b2_ref[...]
    h = jnp.maximum(h, 0.0)
    # Output layer, transposed: (act_pad, h2) x (tb, h2)^T -> (act_pad, tb).
    # Batch lives on the lane axis -> unmasked lane-dense stores and only
    # act_pad sublanes of tanh instead of a 128-lane padded block.
    o = lax.dot_general(w3t_ref[...], h,
                        dimension_numbers=(((1,), (1,)), ((), ())),
                        preferred_element_type=jnp.float32)
    o = o + b3t_ref[...]
    out_ref[...] = act_limit * jnp.tanh(o)


def pack_actor_params(params):
    """Pad / transpose parameters ONCE (amortized across forward calls)."""
    w1, b1, w2, b2, w3, b3 = params
    obs_dim, h1 = w1.shape
    h2 = w2.shape[1]
    act_dim = w3.shape[1]

    d_h1 = _round_up(h1, LANE)
    d_h2 = _round_up(h2, LANE)
    d_out = _round_up(act_dim, SUBLANE)   # only sublane-pad the tiny act dim

    packed = (
        _pad2d(w1.astype(jnp.float32), obs_dim, d_h1),
        _pad2d(b1.astype(jnp.float32).reshape(1, -1), 1, d_h1),
        _pad2d(w2.astype(jnp.float32), d_h1, d_h2),
        _pad2d(b2.astype(jnp.float32).reshape(1, -1), 1, d_h2),
        _pad2d(w3.astype(jnp.float32).T, d_out, d_h2),        # (act_pad, h2)
        _pad2d(b3.astype(jnp.float32).reshape(-1, 1), d_out, 1),
    )
    dims = (obs_dim, act_dim)
    return packed, dims


def _choose_batch_tile(B, tile_b):
    """Batch tile: multiple of 256, <= tile_b, and >=2 grid steps when possible
    (so both v7x TensorCores get work via the 'parallel' batch axis)."""
    B_pad = _round_up(max(B, 1), TILE_QUANTUM)
    n_tiles = B_pad // TILE_QUANTUM
    max_tpb = max(1, tile_b // TILE_QUANTUM)
    if n_tiles >= 2:
        max_tpb = min(max_tpb, (n_tiles + 1) // 2)   # keep >= 2 grid steps
    tpb = 1
    for d in range(1, max_tpb + 1):                  # largest divisor <= cap
        if n_tiles % d == 0:
            tpb = d
    return tpb * TILE_QUANTUM, B_pad


def actor_forward(obs, packed_params, dims, act_limit, *, tile_b=DEFAULT_TILE_B):
    """Fused MLP policy forward. obs: (B, obs_dim). Returns (B, act_dim) f32."""
    w1_p, b1_p, w2_p, b2_p, w3t_p, b3t_p = packed_params
    obs_dim, act_dim = dims
    B = obs.shape[0]
    assert obs.shape[1] == obs_dim

    d_h1 = w1_p.shape[1]
    d_h2 = w2_p.shape[1]
    d_out = w3t_p.shape[0]

    tb, B_pad = _choose_batch_tile(B, tile_b)
    grid = (B_pad // tb,)

    # Only batch-dim padding (no feature padding of obs).
    obs_p = obs.astype(jnp.float32)
    if B_pad != B:
        obs_p = jnp.pad(obs_p, ((0, B_pad - B), (0, 0)))

    def const_spec(shape):
        # Same block every grid step -> stays resident in VMEM, DMA'd once.
        return pl.BlockSpec(shape, lambda i: (0, 0))

    # VMEM budget: double-buffered obs/out tiles, (double-buffered) resident
    # params, fused intermediates + headroom; capped at 3/4 of chip VMEM.
    need = 4 * (
        2 * tb * obs_dim + 2 * d_out * tb
        + 2 * (obs_dim * d_h1 + d_h1 * d_h2 + d_out * d_h2 + d_h1 + d_h2 + d_out)
        + 2 * tb * max(d_h1, d_h2)
    ) + (8 << 20)
    try:
        vmem_cap = int(pltpu.get_tpu_info().vmem_capacity_bytes)
    except Exception:
        vmem_cap = 64 << 20   # v7x (smallest VMEM) as the conservative fallback
    vmem_limit = int(min(max(need, 16 << 20), (vmem_cap * 3) // 4))

    kernel = functools.partial(_actor_kernel, act_limit=float(act_limit))

    out_t = pl.pallas_call(
        kernel,
        out_shape=jax.ShapeDtypeStruct((d_out, B_pad), jnp.float32),
        grid=grid,
        in_specs=[
            pl.BlockSpec((tb, obs_dim), lambda i: (i, 0)),    # obs: streamed tiles
            const_spec((obs_dim, d_h1)), const_spec((1, d_h1)),
            const_spec((d_h1, d_h2)), const_spec((1, d_h2)),
            const_spec((d_out, d_h2)), const_spec((d_out, 1)),
        ],
        out_specs=pl.BlockSpec((d_out, tb), lambda i: (0, i)),  # batch on lanes
        compiler_params=pltpu.CompilerParams(
            dimension_semantics=("parallel",),
            vmem_limit_bytes=vmem_limit,
        ),
    )(obs_p, w1_p, b1_p, w2_p, b2_p, w3t_p, b3t_p)

    # (act_pad, B_pad) -> (B, act_dim)
    return out_t[:act_dim, :B].T


def init_actor_params(key, obs_dim, hidden_sizes, act_dim):
    """Deterministic init mimicking PyTorch Linear default (uniform +/- 1/sqrt(fan_in))."""
    sizes = [obs_dim] + list(hidden_sizes) + [act_dim]
    params = []
    for j in range(len(sizes) - 1):
        fan_in, fan_out = sizes[j], sizes[j + 1]
        key, kw, kb = jax.random.split(key, 3)
        bound = 1.0 / (fan_in ** 0.5)
        w = jax.random.uniform(kw, (fan_in, fan_out), jnp.float32, -bound, bound)
        b = jax.random.uniform(kb, (1, fan_out), jnp.float32, -bound, bound)
        params += [w, b]
    return tuple(params)


def actor_reference(obs, params, act_limit):
    """Pure-JAX reference for correctness check."""
    w1, b1, w2, b2, w3, b3 = params
    h = jnp.maximum(obs @ w1 + b1, 0.0)
    h = jnp.maximum(h @ w2 + b2, 0.0)
    return act_limit * jnp.tanh(h @ w3 + b3)


if __name__ == "__main__":
    obs_dim = 16
    act_dim = 8
    hidden_sizes = (32, 32)
    act_limit = 2.0

    key = jax.random.PRNGKey(0)
    key, k1, k2, k3 = jax.random.split(key, 4)
    params = init_actor_params(key, obs_dim, hidden_sizes, act_dim)
    packed, dims = pack_actor_params(params)   # pad/transpose once, reuse below

    # Small batch (single grid step).
    obs = jax.random.normal(k1, (4, obs_dim), dtype=jnp.float32)
    out = jax.block_until_ready(actor_forward(obs, packed, dims, act_limit))
    ref = actor_reference(obs, params, act_limit)
    assert out.shape == (4, act_dim)
    assert jnp.allclose(out, ref, atol=1e-5, rtol=1e-5)

    # Non-tile-aligned batch (2 grid steps of 256, batch padding sliced off).
    obs2 = jax.random.normal(k2, (300, obs_dim), dtype=jnp.float32)
    out2 = jax.block_until_ready(actor_forward(obs2, packed, dims, act_limit))
    ref2 = actor_reference(obs2, params, act_limit)
    assert out2.shape == (300, act_dim)
    assert jnp.allclose(out2, ref2, atol=1e-5, rtol=1e-5)

    # Larger batch (exercises the bigger 1024-row tile, 2 grid steps).
    obs3 = jax.random.normal(k3, (2048, obs_dim), dtype=jnp.float32)
    out3 = jax.block_until_ready(actor_forward(obs3, packed, dims, act_limit))
    ref3 = actor_reference(obs3, params, act_limit)
    assert out3.shape == (2048, act_dim)
    assert jnp.allclose(out3, ref3, atol=1e-5, rtol=1e-5)

    print("KERNEL_OK")
</pallas_src>

<mosaic_0001>
module attributes {stable_mosaic.version = 11 : i64} {
  func.func @_actor_kernel(%arg0: i32, %arg1: memref<256x16xf32, #tpu.memory_space<vmem>>, %arg2: memref<16x128xf32, #tpu.memory_space<vmem>>, %arg3: memref<1x128xf32, #tpu.memory_space<vmem>>, %arg4: memref<128x128xf32, #tpu.memory_space<vmem>>, %arg5: memref<1x128xf32, #tpu.memory_space<vmem>>, %arg6: memref<8x128xf32, #tpu.memory_space<vmem>>, %arg7: memref<8x1xf32, #tpu.memory_space<vmem>>, %arg8: memref<8x256xf32, #tpu.memory_space<vmem>>) attributes {dimension_semantics = [#tpu.dimension_semantics<parallel>], iteration_bounds = array<i64: 1>, scalar_prefetch = 0 : i64, scratch_operands = 0 : i64, tpu.core_type = #tpu.core_type<tc>, window_params = [{transform_indices = @transform_0, window_bounds = array<i64: 256, 16>}, {pipeline_mode = #tpu.pipeline_mode<synchronous>, transform_indices = @transform_1, window_bounds = array<i64: 16, 128>}, {pipeline_mode = #tpu.pipeline_mode<synchronous>, transform_indices = @transform_2, window_bounds = array<i64: 1, 128>}, {pipeline_mode = #tpu.pipeline_mode<synchronous>, transform_indices = @transform_3, window_bounds = array<i64: 128, 128>}, {pipeline_mode = #tpu.pipeline_mode<synchronous>, transform_indices = @transform_4, window_bounds = array<i64: 1, 128>}, {pipeline_mode = #tpu.pipeline_mode<synchronous>, transform_indices = @transform_5, window_bounds = array<i64: 8, 128>}, {pipeline_mode = #tpu.pipeline_mode<synchronous>, transform_indices = @transform_6, window_bounds = array<i64: 8, 1>}, {transform_indices = @transform_7, window_bounds = array<i64: 8, 256>}]} {
    %c0 = arith.constant 0 : index
    %c0_0 = arith.constant 0 : index
    %0 = vector.load %arg1[%c0, %c0_0] : memref<256x16xf32, #tpu.memory_space<vmem>>, vector<256x16xf32>
    %c0_1 = arith.constant 0 : index
    %c0_2 = arith.constant 0 : index
    %1 = vector.load %arg2[%c0_1, %c0_2] : memref<16x128xf32, #tpu.memory_space<vmem>>, vector<16x128xf32>
    %cst = arith.constant dense<0.000000e+00> : vector<256x128xf32>
    %2 = tpu.matmul %0, %1, %cst {dimension_numbers = #tpu.dot_dimension_numbers<[1], [0], [0], [1], [0, 0, 1, 1], [], []>} : vector<256x16xf32>, vector<16x128xf32>, vector<256x128xf32> -> vector<256x128xf32>
    %c0_3 = arith.constant 0 : index
    %c0_4 = arith.constant 0 : index
    %3 = vector.load %arg3[%c0_3, %c0_4] : memref<1x128xf32, #tpu.memory_space<vmem>>, vector<1x128xf32>
    %4 = vector.broadcast %3 : vector<1x128xf32> to vector<256x128xf32>
    %5 = arith.addf %2, %4 : vector<256x128xf32>
    %cst_5 = arith.constant 0.000000e+00 : f32
    %6 = vector.broadcast %cst_5 : f32 to vector<256x128xf32>
    %7 = arith.maximumf %5, %6 : vector<256x128xf32>
    %c0_6 = arith.constant 0 : index
    %c0_7 = arith.constant 0 : index
    %8 = vector.load %arg4[%c0_6, %c0_7] : memref<128x128xf32, #tpu.memory_space<vmem>>, vector<128x128xf32>
    %cst_8 = arith.constant dense<0.000000e+00> : vector<256x128xf32>
    %9 = tpu.matmul %7, %8, %cst_8 {dimension_numbers = #tpu.dot_dimension_numbers<[1], [0], [0], [1], [0, 0, 1, 1], [], []>} : vector<256x128xf32>, vector<128x128xf32>, vector<256x128xf32> -> vector<256x128xf32>
    %c0_9 = arith.constant 0 : index
    %c0_10 = arith.constant 0 : index
    %10 = vector.load %arg5[%c0_9, %c0_10] : memref<1x128xf32, #tpu.memory_space<vmem>>, vector<1x128xf32>
    %11 = vector.broadcast %10 : vector<1x128xf32> to vector<256x128xf32>
    %12 = arith.addf %9, %11 : vector<256x128xf32>
    %cst_11 = arith.constant 0.000000e+00 : f32
    %13 = vector.broadcast %cst_11 : f32 to vector<256x128xf32>
    %14 = arith.maximumf %12, %13 : vector<256x128xf32>
    %c0_12 = arith.constant 0 : index
    %c0_13 = arith.constant 0 : index
    %15 = vector.load %arg6[%c0_12, %c0_13] : memref<8x128xf32, #tpu.memory_space<vmem>>, vector<8x128xf32>
    %cst_14 = arith.constant dense<0.000000e+00> : vector<8x256xf32>
    %16 = tpu.matmul %15, %14, %cst_14 {dimension_numbers = #tpu.dot_dimension_numbers<[1], [1], [0], [0], [0, 0, 1, 0], [], []>} : vector<8x128xf32>, vector<256x128xf32>, vector<8x256xf32> -> vector<8x256xf32>
    %c0_15 = arith.constant 0 : index
    %c0_16 = arith.constant 0 : index
    %17 = vector.load %arg7[%c0_15, %c0_16] : memref<8x1xf32, #tpu.memory_space<vmem>>, vector<8x1xf32>
    %18 = vector.broadcast %17 : vector<8x1xf32> to vector<8x256xf32>
    %19 = arith.addf %16, %18 : vector<8x256xf32>
    %20 = math.tanh %19 : vector<8x256xf32>
    %cst_17 = arith.constant 2.000000e+00 : f32
    %21 = vector.broadcast %cst_17 : f32 to vector<8x256xf32>
    %22 = arith.mulf %21, %20 : vector<8x256xf32>
    %c0_18 = arith.constant 0 : index
    %c0_19 = arith.constant 0 : index
    %23 = vector.load %arg8[%c0_18, %c0_19] : memref<8x256xf32, #tpu.memory_space<vmem>>, vector<8x256xf32>
    tpu.vector_store %arg8[%c0_18, %c0_19], %22 {strides = array<i32>} : memref<8x256xf32, #tpu.memory_space<vmem>>, vector<8x256xf32>,
    return
  }
  func.func @transform_0(%arg0: i32) -> (i32, i32) {
    %c0_i32 = arith.constant 0 : i32
    %c0_i32_0 = arith.constant 0 : i32
    return %arg0, %c0_i32 : i32, i32
  }
  func.func @transform_1(%arg0: i32) -> (i32, i32) {
    %c0_i32 = arith.constant 0 : i32
    %c0_i32_0 = arith.constant 0 : i32
    %c0_i32_1 = arith.constant 0 : i32
    return %c0_i32, %c0_i32_0 : i32, i32
  }
  func.func @transform_2(%arg0: i32) -> (i32, i32) {
    %c0_i32 = arith.constant 0 : i32
    %c0_i32_0 = arith.constant 0 : i32
    %c0_i32_1 = arith.constant 0 : i32
    return %c0_i32, %c0_i32_0 : i32, i32
  }
  func.func @transform_3(%arg0: i32) -> (i32, i32) {
    %c0_i32 = arith.constant 0 : i32
    %c0_i32_0 = arith.constant 0 : i32
    %c0_i32_1 = arith.constant 0 : i32
    return %c0_i32, %c0_i32_0 : i32, i32
  }
  func.func @transform_4(%arg0: i32) -> (i32, i32) {
    %c0_i32 = arith.constant 0 : i32
    %c0_i32_0 = arith.constant 0 : i32
    %c0_i32_1 = arith.constant 0 : i32
    return %c0_i32, %c0_i32_0 : i32, i32
  }
  func.func @transform_5(%arg0: i32) -> (i32, i32) {
    %c0_i32 = arith.constant 0 : i32
    %c0_i32_0 = arith.constant 0 : i32
    %c0_i32_1 = arith.constant 0 : i32
    return %c0_i32, %c0_i32_0 : i32, i32
  }
  func.func @transform_6(%arg0: i32) -> (i32, i32) {
    %c0_i32 = arith.constant 0 : i32
    %c0_i32_0 = arith.constant 0 : i32
    %c0_i32_1 = arith.constant 0 : i32
    return %c0_i32, %c0_i32_0 : i32, i32
  }
  func.func @transform_7(%arg0: i32) -> (i32, i32) {
    %c0_i32 = arith.constant 0 : i32
    %c0_i32_0 = arith.constant 0 : i32
    return %c0_i32, %arg0 : i32, i32
  }
}

</mosaic_0001>

<bundles_post_ra>
// kernel: tpu_custom_call.1
= control target key start
LH: loop header
LB: loop body
LE: loop exit
PB: predicated region body
PF: predicated region fallthrough
CT: control target
= control target key end

     0   :  { %vm68_vm0 = vcmask 130048   ;;  %s1522_s0 = inlined_call_operand.vmem [shape: f32[256,16], index: 0, kind: input, shape index: {}]   ;;  %s1523_s1 = inlined_call_operand.vmem [shape: f32[16,128], index: 1, kind: input, shape index: {}]   ;;  %s1524_s2 = inlined_call_operand.vmem [shape: f32[1,128], index: 2, kind: input, shape index: {}]   ;;  %s1525_s3 = inlined_call_operand.vmem [shape: f32[128,128], index: 3, kind: input, shape index: {}]   ;;  %s1526_s4 = inlined_call_operand.vmem [shape: f32[1,128], index: 4, kind: input, shape index: {}]   ;;  %s1527_s5 = inlined_call_operand.vmem [shape: f32[8,128], index: 5, kind: input, shape index: {}]   ;;  %s1528_s6 = inlined_call_operand.vmem [shape: f32[8,1], index: 6, kind: input, shape index: {}]   ;;  %s1529_s7 = inlined_call_operand.hbm [shape: f32[8,256], index: 7, kind: output, shape index: {}]  }
   0x1   :  { %v59_v0 = vld [vmem:[%s1523_s1] sm:$0xff]  ;;  %v60_v1 = vld [vmem:[%s1523_s1 + $0x8] sm:$0xff]  ;;  %v29_v5 = vld [vmem:[%s1522_s0 + $0x10] sm:$0xff] }
   0x2   :  { %v27_v2 = vld [vmem:[%s1522_s0] sm:$0xff]  ;;  %v1082_v3 = vpack.c.bf16 %v60_v1, %v59_v0  ;;  %v28_v4 = vld [vmem:[%s1522_s0 + $0x8] sm:$0xff]  ;;  %v30_v6 = vld [vmem:[%s1522_s0 + $0x18] sm:$0xff] }
   0x3   :  { %954 = vmatprep.mubr.msk.f32.mxu0 %vm68_vm0, %v27_v2  ;;  %v31_v7 = vld [vmem:[%s1522_s0 + $0x20] sm:$0xff]  ;;  %v423_v9 = vld [vmem:[%s1525_s3 + $0x8] sm:$0xff]  ;;  %v424_v12 = vld [vmem:[%s1525_s3 + $0x10] sm:$0xff] }
   0x4   :  { %1083 = vmatprep.subr.bf16.mxu0 %v1082_v3  ;;  %v422_v8 = vld [vmem:[%s1525_s3] sm:$0xff]  ;;  %v32_v10 = vld [vmem:[%s1522_s0 + $0x28] sm:$0xff]  ;;  %v425_v13 = vld [vmem:[%s1525_s3 + $0x18] sm:$0xff] }
   0x5   :  { %1085 = vmatpush3.bf16.msra.mxu0 %v1082_v3  ;;  %v1086_v11 = vpack.c.bf16 %v423_v9, %v422_v8  ;;  %v33_v14 = vld [vmem:[%s1522_s0 + $0x30] sm:$0xff]  ;;  %v1090_v15 = vpack.c.bf16 %v425_v13, %v424_v12  ;;  %v426_v16 = vld [vmem:[%s1525_s3 + $0x20] sm:$0xff]  ;;  %v427_v17 = vld [vmem:[%s1525_s3 + $0x28] sm:$0xff] }
   0x6   :  { %v34_v18 = vld [vmem:[%s1522_s0 + $0x38] sm:$0xff]  ;;  %v1094_v19 = vpack.c.bf16 %v427_v17, %v426_v16 }
   0x7   :  { %1087 = vmatprep.subr.bf16.mxu1 %v1086_v11 }
   0x8   :  { %955 = vmatmul.mubr.msk.f32.vlgmr.msra.gmra.mrb[0].mxu0 %vm68_vm0, %v28_v4  ;;  %1089 = vmatpush3.bf16.msra.mxu1 %v1086_v11 }
   0x9   :  { %957 = vmatprep.mubr.msk.f32.mxu0 %vm68_vm0, %v29_v5  ;;  %1091 = vmatprep.subr.bf16.mxu1 %v1090_v15 }
   0xc   :  { %958 = vmatmul.mubr.msk.f32.gmra.mrb[2].mxu0 %vm68_vm0, %v30_v6 }
   0xd   :  { %960 = vmatprep.mubr.msk.f32.mxu0 %vm68_vm0, %v31_v7 }
  0x10   :  { %961 = vmatmul.mubr.msk.f32.gmra.mrb[4].mxu0 %vm68_vm0, %v32_v10 }
  0x11   :  { %963 = vmatprep.mubr.msk.f32.mxu0 %vm68_vm0, %v33_v14 }
  0x12   :  { %12 = vsyncpa [#allocation3], 0  ;;  %v35_v20 = vld [vmem:[%s1522_s0 + $0x40] sm:$0xff]  ;;  %v428_v21 = vld [vmem:[%s1525_s3 + $0x30] sm:$0xff]  ;;  %1093 = vmatpush3.bf16.msra.mxu1 %v1090_v15 }
  0x13   :  { %v429_v22 = vld [vmem:[%s1525_s3 + $0x38] sm:$0xff]  ;;  %v36_v23 = vld [vmem:[%s1522_s0 + $0x48] sm:$0xff]  ;;  %1095 = vmatprep.subr.bf16.mxu1 %v1094_v19  ;;  %v37_v25 = vld [vmem:[%s1522_s0 + $0x50] sm:$0xff] }
  0x14   :  { %964 = vmatmul.mubr.msk.f32.gmra.mrb[6].mxu0 %vm68_vm0, %v34_v18  ;;  %v1098_v24 = vpack.c.bf16 %v429_v22, %v428_v21  ;;  %v430_v26 = vld [vmem:[%s1525_s3 + $0x40] sm:$0xff]  ;;  %v431_v27 = vld [vmem:[%s1525_s3 + $0x48] sm:$0xff]  ;;  %v38_v28 = vld [vmem:[%s1522_s0 + $0x58] sm:$0xff] }
  0x15   :  { %966 = vmatprep.mubr.msk.f32.mxu0 %vm68_vm0, %v35_v20  ;;  %v1102_v29 = vpack.c.bf16 %v431_v27, %v430_v26  ;;  %v39_v30 = vld [vmem:[%s1522_s0 + $0x60] sm:$0xff]  ;;  %v432_v31 = vld [vmem:[%s1525_s3 + $0x50] sm:$0xff]  ;;  %v433_v32 = vld [vmem:[%s1525_s3 + $0x58] sm:$0xff] }
  0x16   :  { %1097 = vmatpush3.bf16.msra.mxu1 %v1094_v19  ;;  %v40_v33 = vld [vmem:[%s1522_s0 + $0x68] sm:$0xff]  ;;  %v1106_v34 = vpack.c.bf16 %v433_v32, %v432_v31  ;;  %v41_v35 = vld [vmem:[%s1522_s0 + $0x70] sm:$0xff]  ;;  %v434_v36 = vld [vmem:[%s1525_s3 + $0x60] sm:$0xff] }
  0x17   :  { %1099 = vmatprep.subr.bf16.mxu1 %v1098_v24  ;;  %v435_v37 = vld [vmem:[%s1525_s3 + $0x68] sm:$0xff]  ;;  %v42_v38 = vld [vmem:[%s1522_s0 + $0x78] sm:$0xff]  ;;  %v43_v40 = vld [vmem:[%s1522_s0 + $0x80] sm:$0xff] }
  0x18   :  { %967 = vmatmul.mubr.msk.f32.gmra.mrb[8].mxu0 %vm68_vm0, %v36_v23  ;;  %v1110_v39 = vpack.c.bf16 %v435_v37, %v434_v36  ;;  %v44_v41 = vld [vmem:[%s1522_s0 + $0x88] sm:$0xff]  ;;  %v45_v42 = vld [vmem:[%s1522_s0 + $0x90] sm:$0xff]  ;;  %v46_v43 = vld [vmem:[%s1522_s0 + $0x98] sm:$0xff] }
  0x19   :  { %969 = vmatprep.mubr.msk.f32.mxu0 %vm68_vm0, %v37_v25  ;;  %v47_v44 = vld [vmem:[%s1522_s0 + $0xa0] sm:$0xff]  ;;  %v48_v45 = vld [vmem:[%s1522_s0 + $0xa8] sm:$0xff]  ;;  %v49_v46 = vld [vmem:[%s1522_s0 + $0xb0] sm:$0xff] }
  0x1a   :  { %1101 = vmatpush3.bf16.msra.mxu1 %v1098_v24  ;;  %v50_v47 = vld [vmem:[%s1522_s0 + $0xb8] sm:$0xff]  ;;  %v51_v48 = vld [vmem:[%s1522_s0 + $0xc0] sm:$0xff]  ;;  %v52_v49 = vld [vmem:[%s1522_s0 + $0xc8] sm:$0xff] }
  0x1b   :  { %1103 = vmatprep.subr.bf16.mxu1 %v1102_v29  ;;  %v53_v50 = vld [vmem:[%s1522_s0 + $0xd0] sm:$0xff]  ;;  %v54_v51 = vld [vmem:[%s1522_s0 + $0xd8] sm:$0xff]  ;;  %v55_v52 = vld [vmem:[%s1522_s0 + $0xe0] sm:$0xff] }
  0x1c   :  { %970 = vmatmul.mubr.msk.f32.gmra.mrb[10].mxu0 %vm68_vm0, %v38_v28  ;;  %v56_v53 = vld [vmem:[%s1522_s0 + $0xe8] sm:$0xff]  ;;  %v57_v54 = vld [vmem:[%s1522_s0 + $0xf0] sm:$0xff]  ;;  %v58_v55 = vld [vmem:[%s1522_s0 + $0xf8] sm:$0xff] }
  0x1d   :  { %972 = vmatprep.mubr.msk.f32.mxu0 %vm68_vm0, %v39_v30  ;;  %v436_v56 = vld [vmem:[%s1525_s3 + $0x70] sm:$0xff]  ;;  %v437_v57 = vld [vmem:[%s1525_s3 + $0x78] sm:$0xff]  ;;  %v1408_v59 = vld [vmem:[%s1524_s2] ss:$0 sm:$0xff] }
  0x1e   :  { %1105 = vmatpush3.bf16.msra.mxu1 %v1102_v29  ;;  %v1114_v58 = vpack.c.bf16 %v437_v57, %v436_v56 }
  0x1f   :  { %1107 = vmatprep.subr.bf16.mxu1 %v1106_v34 }
  0x20   :  { %973 = vmatmul.mubr.msk.f32.gmra.mrb[12].mxu0 %vm68_vm0, %v40_v33 }
  0x21   :  { %975 = vmatprep.mubr.msk.f32.mxu0 %vm68_vm0, %v41_v35 }
  0x22   :  { %1109 = vmatpush3.bf16.msra.mxu1 %v1106_v34 }
  0x23   :  { %1111 = vmatprep.subr.bf16.mxu1 %v1110_v39 }
  0x24   :  { %976 = vmatmul.mubr.msk.f32.gmra.mrb[14].mxu0 %vm68_vm0, %v42_v38 }
  0x25   :  { %978 = vmatprep.mubr.msk.f32.mxu0 %vm68_vm0, %v43_v40 }
  0x26   :  { %1113 = vmatpush3.bf16.msra.mxu1 %v1110_v39 }
  0x27   :  { %1115 = vmatprep.subr.bf16.mxu1 %v1114_v58 }
  0x28   :  { %979 = vmatmul.mubr.msk.f32.gmra.mrb[16].mxu0 %vm68_vm0, %v44_v41 }
  0x29   :  { %981 = vmatprep.mubr.msk.f32.mxu0 %vm68_vm0, %v45_v42 }
  0x2a   :  { %1117 = vmatpush3.bf16.msra.mxu1 %v1114_v58 }
  0x2c   :  { %982 = vmatmul.mubr.msk.f32.gmra.mrb[18].mxu0 %vm68_vm0, %v46_v43 }
  0x2d   :  { %984 = vmatprep.mubr.msk.f32.mxu0 %vm68_vm0, %v47_v44 }
  0x30   :  { %985 = vmatmul.mubr.msk.f32.gmra.mrb[20].mxu0 %vm68_vm0, %v48_v45 }
  0x31   :  { %987 = vmatprep.mubr.msk.f32.mxu0 %vm68_vm0, %v49_v46 }
  0x34   :  { %988 = vmatmul.mubr.msk.f32.gmra.mrb[22].mxu0 %vm68_vm0, %v50_v47 }
  0x35   :  { %990 = vmatprep.mubr.msk.f32.mxu0 %vm68_vm0, %v51_v48 }
  0x38   :  { %991 = vmatmul.mubr.msk.f32.gmra.mrb[24].mxu0 %vm68_vm0, %v52_v49 }
  0x39   :  { %993 = vmatprep.mubr.msk.f32.mxu0 %vm68_vm0, %v53_v50 }
  0x3c   :  { %994 = vmatmul.mubr.msk.f32.gmra.mrb[26].mxu0 %vm68_vm0, %v54_v51 }
  0x3d   :  { %996 = vmatprep.mubr.msk.f32.mxu0 %vm68_vm0, %v55_v52 }
  0x40   :  { %997 = vmatmul.mubr.msk.f32.gmra.mrb[28].mxu0 %vm68_vm0, %v56_v53 }
  0x41   :  { %999 = vmatprep.mubr.msk.f32.mxu0 %vm68_vm0, %v57_v54 }
  0x44   :  { %1000 = vmatmul.mubr.msk.f32.gmra.mrb[30].mxu0 %vm68_vm0, %v58_v55 }
  0xdb   :  { %v956_v60 = vpop.f32.mrb[0].mxu0 }
  0xdc   :  { %v237_v61 = vadd.f32 %v956_v60, %v1408_v59  ;;  %v231_v62 = vpop.f32.mrb[1].mxu0 }
  0xdd   :  { %v232_v63 = vadd.f32 %v1408_v59, %v231_v62 }
  0xde   :  { %v391_v2 = vmax.f32 %v237_v61, 0.0 }
  0xdf   :  { %v959_v0 = vpop.f32.mrb[2].mxu0  ;;  %v390_v1 = vmax.f32 %v232_v63, 0.0 }
  0xe0   :  { %v247_v3 = vadd.f32 %v959_v0, %v1408_v59  ;;  %v241_v4 = vpop.f32.mrb[3].mxu0 }
  0xe1   :  { %v242_v5 = vadd.f32 %v1408_v59, %v241_v4  ;;  %1034 = vmatprep.mubr.f32.mxu1 %v390_v1 }
  0xe2   :  { %1035 = vmatmul.mubr.f32.vlgmr.msra.gmra.mrb[0].mxu1 %v391_v2  ;;  %v393_v8 = vmax.f32 %v247_v3, 0.0 }
  0xe3   :  { %v392_v6 = vmax.f32 %v242_v5, 0.0  ;;  %v962_v7 = vpop.f32.mrb[4].mxu0 }
  0xe4   :  { %v257_v9 = vadd.f32 %v962_v7, %v1408_v59  ;;  %v251_v10 = vpop.f32.mrb[5].mxu0 }
  0xe5   :  { %v252_v11 = vadd.f32 %v1408_v59, %v251_v10  ;;  %1037 = vmatprep.mubr.f32.mxu1 %v392_v6 }
  0xe6   :  { %1038 = vmatmul.mubr.f32.gmra.mrb[2].mxu1 %v393_v8  ;;  %v395_v14 = vmax.f32 %v257_v9, 0.0 }
  0xe7   :  { %v394_v12 = vmax.f32 %v252_v11, 0.0  ;;  %v965_v13 = vpop.f32.mrb[6].mxu0 }
  0xe8   :  { %v267_v15 = vadd.f32 %v965_v13, %v1408_v59  ;;  %v261_v16 = vpop.f32.mrb[7].mxu0 }
  0xe9   :  { %v262_v17 = vadd.f32 %v1408_v59, %v261_v16  ;;  %1040 = vmatprep.mubr.f32.mxu1 %v394_v12 }
  0xea   :  { %1041 = vmatmul.mubr.f32.gmra.mrb[4].mxu1 %v395_v14  ;;  %v397_v20 = vmax.f32 %v267_v15, 0.0 }
  0xeb   :  { %v396_v18 = vmax.f32 %v262_v17, 0.0  ;;  %v968_v19 = vpop.f32.mrb[8].mxu0 }
  0xec   :  { %v277_v21 = vadd.f32 %v968_v19, %v1408_v59  ;;  %v271_v22 = vpop.f32.mrb[9].mxu0 }
  0xed   :  { %v272_v23 = vadd.f32 %v1408_v59, %v271_v22  ;;  %1043 = vmatprep.mubr.f32.mxu1 %v396_v18 }
  0xee   :  { %1044 = vmatmul.mubr.f32.gmra.mrb[6].mxu1 %v397_v20  ;;  %v399_v26 = vmax.f32 %v277_v21, 0.0 }
  0xef   :  { %v398_v24 = vmax.f32 %v272_v23, 0.0  ;;  %v971_v25 = vpop.f32.mrb[10].mxu0 }
  0xf0   :  { %v287_v27 = vadd.f32 %v971_v25, %v1408_v59  ;;  %v281_v28 = vpop.f32.mrb[11].mxu0 }
  0xf1   :  { %v282_v29 = vadd.f32 %v1408_v59, %v281_v28  ;;  %1046 = vmatprep.mubr.f32.mxu1 %v398_v24 }
  0xf2   :  { %1047 = vmatmul.mubr.f32.gmra.mrb[8].mxu1 %v399_v26  ;;  %v401_v32 = vmax.f32 %v287_v27, 0.0 }
  0xf3   :  { %v400_v30 = vmax.f32 %v282_v29, 0.0  ;;  %v974_v31 = vpop.f32.mrb[12].mxu0  ;;  %v1445_v29 = vld [vmem:[%s1527_s5] sm:$0xff] }
  0xf4   :  { %v297_v33 = vadd.f32 %v974_v31, %v1408_v59  ;;  %v291_v34 = vpop.f32.mrb[13].mxu0  ;;  %948 = vmatprep.mubr.f32.mxu0 %v1445_v29  ;;  %v1181_v31 = vmov 0  }
  0xf5   :  { %v292_v35 = vadd.f32 %v1408_v59, %v291_v34  ;;  %1049 = vmatprep.mubr.f32.mxu1 %v400_v30  ;;  %v703_v30 = vld [vmem:[%s1528_s6] sm:$0xff]  ;;  %1152 = vset.pattern.permute.xlu0 %v1181_v31 }
  0xf6   :  { %1050 = vmatmul.mubr.f32.gmra.mrb[10].mxu1 %v401_v32  ;;  %v403_v38 = vmax.f32 %v297_v33, 0.0  ;;  %706 = vperm.xlu0 %1152, %v703_v30  }
  0xf7   :  { %v402_v36 = vmax.f32 %v292_v35, 0.0  ;;  %v977_v37 = vpop.f32.mrb[14].mxu0 }
  0xf8   :  { %v307_v39 = vadd.f32 %v977_v37, %v1408_v59  ;;  %v301_v40 = vpop.f32.mrb[15].mxu0 }
  0xf9   :  { %v302_v41 = vadd.f32 %v1408_v59, %v301_v40  ;;  %1052 = vmatprep.mubr.f32.mxu1 %v402_v36 }
  0xfa   :  { %1053 = vmatmul.mubr.f32.gmra.mrb[12].mxu1 %v403_v38  ;;  %v405_v44 = vmax.f32 %v307_v39, 0.0 }
  0xfb   :  { %v404_v42 = vmax.f32 %v302_v41, 0.0  ;;  %v980_v43 = vpop.f32.mrb[16].mxu0 }
  0xfc   :  { %v317_v45 = vadd.f32 %v980_v43, %v1408_v59  ;;  %v311_v46 = vpop.f32.mrb[17].mxu0 }
  0xfd   :  { %v312_v47 = vadd.f32 %v1408_v59, %v311_v46  ;;  %1055 = vmatprep.mubr.f32.mxu1 %v404_v42 }
  0xfe   :  { %1056 = vmatmul.mubr.f32.gmra.mrb[14].mxu1 %v405_v44  ;;  %v407_v50 = vmax.f32 %v317_v45, 0.0 }
  0xff   :  { %v406_v48 = vmax.f32 %v312_v47, 0.0  ;;  %v983_v49 = vpop.f32.mrb[18].mxu0 }
 0x100   :  { %v327_v51 = vadd.f32 %v983_v49, %v1408_v59  ;;  %v321_v52 = vpop.f32.mrb[19].mxu0 }
 0x101   :  { %v322_v53 = vadd.f32 %v1408_v59, %v321_v52  ;;  %1058 = vmatprep.mubr.f32.mxu1 %v406_v48 }
 0x102   :  { %v409_v54 = vmax.f32 %v327_v51, 0.0  ;;  %1059 = vmatmul.mubr.f32.gmra.mrb[16].mxu1 %v407_v50 }
 0x103   :  { %v408_v55 = vmax.f32 %v322_v53, 0.0  ;;  %v986_v56 = vpop.f32.mrb[20].mxu0 }
 0x104   :  { %v337_v57 = vadd.f32 %v986_v56, %v1408_v59  ;;  %v331_v58 = vpop.f32.mrb[21].mxu0 }
 0x105   :  { %1061 = vmatprep.mubr.f32.mxu1 %v408_v55  ;;  %v332_v60 = vadd.f32 %v1408_v59, %v331_v58 }
 0x106   :  { %1062 = vmatmul.mubr.f32.gmra.mrb[18].mxu1 %v409_v54  ;;  %v411_v61 = vmax.f32 %v337_v57, 0.0 }
 0x107   :  { %v410_v62 = vmax.f32 %v332_v60, 0.0  ;;  %v989_v63 = vpop.f32.mrb[22].mxu0 }
 0x108   :  { %v347_v0 = vadd.f32 %v989_v63, %v1408_v59  ;;  %v341_v1 = vpop.f32.mrb[23].mxu0 }
 0x109   :  { %1064 = vmatprep.mubr.f32.mxu1 %v410_v62  ;;  %v342_v2 = vadd.f32 %v1408_v59, %v341_v1 }
 0x10a   :  { %1065 = vmatmul.mubr.f32.gmra.mrb[20].mxu1 %v411_v61  ;;  %v413_v3 = vmax.f32 %v347_v0, 0.0 }
 0x10b   :  { %v412_v4 = vmax.f32 %v342_v2, 0.0  ;;  %v992_v5 = vpop.f32.mrb[24].mxu0 }
 0x10c   :  { %v357_v6 = vadd.f32 %v992_v5, %v1408_v59  ;;  %v351_v7 = vpop.f32.mrb[25].mxu0 }
 0x10d   :  { %1067 = vmatprep.mubr.f32.mxu1 %v412_v4  ;;  %v352_v8 = vadd.f32 %v1408_v59, %v351_v7 }
 0x10e   :  { %1068 = vmatmul.mubr.f32.gmra.mrb[22].mxu1 %v413_v3  ;;  %v415_v9 = vmax.f32 %v357_v6, 0.0 }
 0x10f   :  { %v414_v10 = vmax.f32 %v352_v8, 0.0  ;;  %v995_v11 = vpop.f32.mrb[26].mxu0 }
 0x110   :  { %v367_v12 = vadd.f32 %v995_v11, %v1408_v59  ;;  %v361_v13 = vpop.f32.mrb[27].mxu0 }
 0x111   :  { %1070 = vmatprep.mubr.f32.mxu1 %v414_v10  ;;  %v362_v14 = vadd.f32 %v1408_v59, %v361_v13 }
 0x112   :  { %1071 = vmatmul.mubr.f32.gmra.mrb[24].mxu1 %v415_v9  ;;  %v417_v15 = vmax.f32 %v367_v12, 0.0 }
 0x113   :  { %v416_v16 = vmax.f32 %v362_v14, 0.0  ;;  %v998_v17 = vpop.f32.mrb[28].mxu0 }
 0x114   :  { %v377_v18 = vadd.f32 %v998_v17, %v1408_v59  ;;  %v371_v19 = vpop.f32.mrb[29].mxu0 }
 0x115   :  { %1073 = vmatprep.mubr.f32.mxu1 %v416_v16  ;;  %v372_v20 = vadd.f32 %v1408_v59, %v371_v19 }
 0x116   :  { %1074 = vmatmul.mubr.f32.gmra.mrb[26].mxu1 %v417_v15  ;;  %v419_v21 = vmax.f32 %v377_v18, 0.0 }
 0x117   :  { %v418_v22 = vmax.f32 %v372_v20, 0.0  ;;  %v1001_v23 = vpop.f32.mrb[30].mxu0 }
 0x118   :  { %v387_v24 = vadd.f32 %v1001_v23, %v1408_v59  ;;  %v381_v25 = vpop.f32.mrb[31].mxu0 }
 0x119   :  { %1076 = vmatprep.mubr.f32.mxu1 %v418_v22  ;;  %v382_v26 = vadd.f32 %v1408_v59, %v381_v25  ;;  %v1454_v59 = vld [vmem:[%s1526_s4] ss:$0 sm:$0xff]  ;;  %s1182_s4 = smov [#allocation2]  }
 0x11a   :  { %1077 = vmatmul.mubr.f32.gmra.mrb[28].mxu1 %v419_v21  ;;  %v421_v27 = vmax.f32 %v387_v24, 0.0  ;;  %s792_s5 = sshll.u32 %s1182_s4, 4  ;;  %s793_s5 = int_to_ptr.vmem [resolvable:$true] %s792_s5 }
 0x11b   :  { %v420_v28 = vmax.f32 %v382_v26, 0.0  ;;  %s1157_s6 = scalar_lea.vmem %s793_s5, 256  ;;  %p1162_p1 = scmp.lt.s32.totalorder %s793_s5, %s793_s5 }
 0x11c   :  { %p1158_p0 = scmp.ne.s32.totalorder %s793_s5, %s1157_s6  ;;  %p1163_p2 = scmp.lt.s32.totalorder %s1157_s6, %s1157_s6 }
 0x11d   :  { %1079 = vmatprep.mubr.f32.mxu1 %v420_v28 }
 0x11e   :  { %1080 = vmatmul.mubr.f32.gmra.mrb[30].mxu1 %v421_v27  ;;  %p1164_p3 = por %p1163_p2, %p1162_p1 }
 0x120   :  { %p1165_p4 = pnand %p1164_p3, %p1158_p0 }
 0x1b5   :  { %v1036_v32 = vpop.f32.mrb[0].mxu1 }
 0x1b6   :  { %v517_v33 = vadd.f32 %v1036_v32, %v1454_v59  ;;  %v511_v34 = vpop.f32.mrb[1].mxu1 }
 0x1b7   :  { %v512_v35 = vadd.f32 %v1454_v59, %v511_v34 }
 0x1b8   :  { %v671_v36 = vmax.f32 %v517_v33, 0.0 }
 0x1b9   :  { %v670_v37 = vmax.f32 %v512_v35, 0.0  ;;  %v1039_v38 = vpop.f32.mrb[2].mxu1 }
 0x1ba   :  { %v527_v39 = vadd.f32 %v1039_v38, %v1454_v59  ;;  %v521_v40 = vpop.f32.mrb[3].mxu1 }
 0x1bb   :  { %v1120_v41 = vpack.c.bf16 %v671_v36, %v670_v37  ;;  %v522_v42 = vadd.f32 %v1454_v59, %v521_v40 }
 0x1bc   :  { %v673_v43 = vmax.f32 %v527_v39, 0.0 }
 0x1bd   :  { %v672_v44 = vmax.f32 %v522_v42, 0.0  ;;  %v1042_v45 = vpop.f32.mrb[4].mxu1 }
 0x1be   :  { %v537_v46 = vadd.f32 %v1042_v45, %v1454_v59  ;;  %v531_v47 = vpop.f32.mrb[5].mxu1 }
 0x1bf   :  { %v1461_v48 = vpack.c.bf16 %v673_v43, %v672_v44  ;;  %v532_v49 = vadd.f32 %v1454_v59, %v531_v47 }
 0x1c0   :  { %v675_v50 = vmax.f32 %v537_v46, 0.0 }
 0x1c1   :  { %v674_v51 = vmax.f32 %v532_v49, 0.0  ;;  %v1045_v52 = vpop.f32.mrb[6].mxu1 }
 0x1c2   :  { %v547_v53 = vadd.f32 %v1045_v52, %v1454_v59  ;;  %v541_v54 = vpop.f32.mrb[7].mxu1 }
 0x1c3   :  { %v1465_v55 = vpack.c.bf16 %v675_v50, %v674_v51  ;;  %v542_v56 = vadd.f32 %v1454_v59, %v541_v54 }
 0x1c4   :  { %v677_v57 = vmax.f32 %v547_v53, 0.0 }
 0x1c5   :  { %v676_v58 = vmax.f32 %v542_v56, 0.0  ;;  %v1048_v60 = vpop.f32.mrb[8].mxu1 }
 0x1c6   :  { %v557_v61 = vadd.f32 %v1048_v60, %v1454_v59  ;;  %v551_v62 = vpop.f32.mrb[9].mxu1 }
 0x1c7   :  { %v1469_v63 = vpack.c.bf16 %v677_v57, %v676_v58  ;;  %v552_v0 = vadd.f32 %v1454_v59, %v551_v62 }
 0x1c8   :  { %v679_v1 = vmax.f32 %v557_v61, 0.0 }
 0x1c9   :  { %v678_v2 = vmax.f32 %v552_v0, 0.0  ;;  %v1051_v3 = vpop.f32.mrb[10].mxu1 }
 0x1ca   :  { %v567_v4 = vadd.f32 %v1051_v3, %v1454_v59  ;;  %v561_v5 = vpop.f32.mrb[11].mxu1 }
 0x1cb   :  { %v1473_v6 = vpack.c.bf16 %v679_v1, %v678_v2  ;;  %v562_v7 = vadd.f32 %v1454_v59, %v561_v5 }
 0x1cc   :  { %v681_v8 = vmax.f32 %v567_v4, 0.0 }
 0x1cd   :  { %v680_v9 = vmax.f32 %v562_v7, 0.0  ;;  %v1054_v10 = vpop.f32.mrb[12].mxu1 }
 0x1ce   :  { %v577_v11 = vadd.f32 %v1054_v10, %v1454_v59  ;;  %v571_v12 = vpop.f32.mrb[13].mxu1 }
 0x1cf   :  { %v1477_v13 = vpack.c.bf16 %v681_v8, %v680_v9  ;;  %v572_v14 = vadd.f32 %v1454_v59, %v571_v12 }
 0x1d0   :  { %v683_v15 = vmax.f32 %v577_v11, 0.0 }
 0x1d1   :  { %v682_v16 = vmax.f32 %v572_v14, 0.0  ;;  %v1057_v17 = vpop.f32.mrb[14].mxu1 }
 0x1d2   :  { %v587_v18 = vadd.f32 %v1057_v17, %v1454_v59  ;;  %v581_v19 = vpop.f32.mrb[15].mxu1 }
 0x1d3   :  { %v1481_v20 = vpack.c.bf16 %v683_v15, %v682_v16  ;;  %v582_v21 = vadd.f32 %v1454_v59, %v581_v19 }
 0x1d4   :  { %v685_v22 = vmax.f32 %v587_v18, 0.0 }
 0x1d5   :  { %v684_v23 = vmax.f32 %v582_v21, 0.0  ;;  %v1060_v24 = vpop.f32.mrb[16].mxu1 }
 0x1d6   :  { %v597_v25 = vadd.f32 %v1060_v24, %v1454_v59  ;;  %v591_v26 = vpop.f32.mrb[17].mxu1 }
 0x1d7   :  { %v1485_v27 = vpack.c.bf16 %v685_v22, %v684_v23  ;;  %v592_v28 = vadd.f32 %v1454_v59, %v591_v26 }
 0x1d8   :  { %v687_v30 = vmax.f32 %v597_v25, 0.0 }
 0x1d9   :  { %v686_v31 = vmax.f32 %v592_v28, 0.0  ;;  %v1063_v32 = vpop.f32.mrb[18].mxu1 }
 0x1da   :  { %v607_v33 = vadd.f32 %v1063_v32, %v1454_v59  ;;  %v601_v34 = vpop.f32.mrb[19].mxu1 }
 0x1db   :  { %v1118_v35 = vpack.c.bf16 %v687_v30, %v686_v31  ;;  %v602_v36 = vadd.f32 %v1454_v59, %v601_v34 }
 0x1dc   :  { %v689_v37 = vmax.f32 %v607_v33, 0.0 }
 0x1dd   :  { %v688_v38 = vmax.f32 %v602_v36, 0.0  ;;  %1119 = vmatprep.subr.bf16.mxu0 %v1118_v35  ;;  %v1066_v39 = vpop.f32.mrb[20].mxu1 }
 0x1de   :  { %1121 = vmatpush3.bf16.xpose.msra.mxu0 %v1120_v41  ;;  %v617_v40 = vadd.f32 %v1066_v39, %v1454_v59  ;;  %v611_v42 = vpop.f32.mrb[21].mxu1 }
 0x1df   :  { %v1122_v43 = vpack.c.bf16 %v689_v37, %v688_v38  ;;  %v612_v44 = vadd.f32 %v1454_v59, %v611_v42 }
 0x1e0   :  { %v691_v45 = vmax.f32 %v617_v40, 0.0 }
 0x1e1   :  { %1123 = vmatprep.subr.bf16.mxu0 %v1122_v43  ;;  %v690_v46 = vmax.f32 %v612_v44, 0.0  ;;  %v1069_v47 = vpop.f32.mrb[22].mxu1 }
 0x1e2   :  { %v627_v49 = vadd.f32 %v1069_v47, %v1454_v59  ;;  %v621_v50 = vpop.f32.mrb[23].mxu1 }
 0x1e3   :  { %v1126_v51 = vpack.c.bf16 %v691_v45, %v690_v46  ;;  %v622_v52 = vadd.f32 %v1454_v59, %v621_v50 }
 0x1e4   :  { %v693_v53 = vmax.f32 %v627_v49, 0.0 }
 0x1e5   :  { %v692_v54 = vmax.f32 %v622_v52, 0.0  ;;  %v1072_v56 = vpop.f32.mrb[24].mxu1 }
 0x1e6   :  { %1125 = vmatpush3.bf16.xpose.msra.mxu0 %v1461_v48  ;;  %v637_v41 = vadd.f32 %v1072_v56, %v1454_v59  ;;  %v631_v57 = vpop.f32.mrb[25].mxu1 }
 0x1e7   :  { %1127 = vmatprep.subr.bf16.mxu0 %v1126_v51  ;;  %v1130_v58 = vpack.c.bf16 %v693_v53, %v692_v54  ;;  %v632_v60 = vadd.f32 %v1454_v59, %v631_v57 }
 0x1e8   :  { %v695_v61 = vmax.f32 %v637_v41, 0.0 }
 0x1e9   :  { %v694_v62 = vmax.f32 %v632_v60, 0.0  ;;  %v1075_v0 = vpop.f32.mrb[26].mxu1 }
 0x1ea   :  { %v647_v1 = vadd.f32 %v1075_v0, %v1454_v59  ;;  %v641_v2 = vpop.f32.mrb[27].mxu1 }
 0x1eb   :  { %v1134_v3 = vpack.c.bf16 %v695_v61, %v694_v62  ;;  %v642_v4 = vadd.f32 %v1454_v59, %v641_v2 }
 0x1ec   :  { %v697_v5 = vmax.f32 %v647_v1, 0.0 }
 0x1ed   :  { %v696_v7 = vmax.f32 %v642_v4, 0.0  ;;  %v1078_v8 = vpop.f32.mrb[28].mxu1 }
 0x1ee   :  { %1129 = vmatpush3.bf16.xpose.msra.mxu0 %v1465_v55  ;;  %v657_v48 = vadd.f32 %v1078_v8, %v1454_v59  ;;  %v651_v9 = vpop.f32.mrb[29].mxu1 }
 0x1ef   :  { %1131 = vmatprep.subr.bf16.mxu0 %v1130_v58  ;;  %v1138_v10 = vpack.c.bf16 %v697_v5, %v696_v7  ;;  %v652_v11 = vadd.f32 %v1454_v59, %v651_v9 }
 0x1f0   :  { %v699_v12 = vmax.f32 %v657_v48, 0.0 }
 0x1f1   :  { %v698_v14 = vmax.f32 %v652_v11, 0.0  ;;  %v1081_v15 = vpop.f32.mrb[30].mxu1 }
 0x1f2   :  { %v667_v16 = vadd.f32 %v1081_v15, %v1454_v59  ;;  %v661_v17 = vpop.f32.mrb[31].mxu1 }
 0x1f3   :  { %v1142_v18 = vpack.c.bf16 %v699_v12, %v698_v14  ;;  %v662_v19 = vadd.f32 %v1454_v59, %v661_v17  ;;  %v707_v59 = vpop.permute.xlu0 %706 }
 0x1f4   :  { %v701_v21 = vmax.f32 %v667_v16, 0.0 }
 0x1f5   :  { %v700_v22 = vmax.f32 %v662_v19, 0.0 }
 0x1f6   :  { %1133 = vmatpush3.bf16.xpose.msra.mxu0 %v1469_v63 }
 0x1f7   :  { %1135 = vmatprep.subr.bf16.mxu0 %v1134_v3  ;;  %v1146_v55 = vpack.c.bf16 %v701_v21, %v700_v22 }
 0x1fe   :  { %1137 = vmatpush3.bf16.xpose.msra.mxu0 %v1473_v6 }
 0x1ff   :  { %1139 = vmatprep.subr.bf16.mxu0 %v1138_v10 }
 0x206   :  { %1141 = vmatpush3.bf16.xpose.msra.mxu0 %v1477_v13 }
 0x207   :  { %1143 = vmatprep.subr.bf16.mxu0 %v1142_v18 }
 0x20e   :  { %1145 = vmatpush3.bf16.xpose.msra.mxu0 %v1481_v20 }
 0x20f   :  { %1147 = vmatprep.subr.bf16.mxu0 %v1146_v55 }
 0x216   :  { %1149 = vmatpush3.bf16.xpose.msra.mxu0 %v1485_v27 }
 0x21d   :  { %949 = vmatmul.mubr.f32.vlgmr.msra.gmra.mrb[32].mxu0 %v1445_v29 }
 0x2f0   :  { %v775_v23 = vpop.f32.mrb[32].mxu0 }
 0x2f1   :  { %v776_v24 = vadd.f32 %v775_v23, %v707_v59  ;;  %v777_v25 = vpop.f32.mrb[33].mxu0 }
 0x2f2   :  { %v778_v63 = vadd.f32 %v777_v25, %v707_v59 }
 0x2f3   :  { %1153 = vtanh.f32 %v776_v24 }
 0x2f4   :  { %1155 = vtanh.f32 %v778_v63 }
 0x2fd   :  { %v1154_v6 = vpop.eup %1153 }
 0x2fe   :  { %v1156_v26 = vpop.eup %1155  ;;  %v782_v13 = vmul.f32 2.0, %v1154_v6 }
 0x2ff   :  { %v783_v28 = vmul.f32 2.0, %v1156_v26 }
 0x300   :  { %784 = vst [vmem:[#allocation2] sm:$0xff] %v782_v13 }
 0x301   :  { %785 = vst [vmem:[#allocation2 + $0x8] sm:$0xff] %v783_v28 }
 0x302   :  { %1168 = shalt.err (!%p1165_p4)
}
 0x303   :  { %s1169_s11 = scalar_lea.hbm %s1529_s7, 256 }
 0x304   :  { %p1170_p5 = scmp.ne.s32.totalorder %s1529_s7, %s1169_s11  ;;  %p1173_p6 = scmp.lt.u32.totalorder %s1169_s11, %s1529_s7 }
 0x306   :  { %p1175_p7 = pnand %p1173_p6, %p1170_p5 }
 0x308   :  { %1178 = shalt.err (!%p1175_p7)
}
 0x309   :  { %795 = dma.vmem_to_hbm [thread:$0]  %s793_s5, 256, %s1529_s7, [#allocation3]  }
 0x30a   :  { %1179 = dma.done.wait [#allocation3], 256  }
 0x30b   :  { %1180 = vsyncadd [#allocation3], 4294967040 }
 0x30c   :  { %799 = vsyncpa [#allocation3], 1 }

</bundles_post_ra>
